<compile_context>
chip_gen: v6e
topology: v6e:2x2x1
jax: 0.10.0
libtpu: 0.0.40
codegen_flags: <defaults>
</compile_context>

<pallas_src>
import functools

import jax
import jax.numpy as jnp
from jax import lax
from jax.experimental import pallas as pl
from jax.experimental.pallas import tpu as pltpu

LANE = 128
SUBLANE = 8


def _chip_profile():
    """Returns (max_tile_rows_for_f32, num_core_split) for the local TPU generation."""
    kind = ""
    try:
        kind = jax.devices()[0].device_kind.lower()
    except Exception:
        pass
    # v5e has a 16 MiB default scoped-VMEM budget and lower HBM BW -> smaller tiles.
    is_v5e = ("v5 lite" in kind) or ("v5e" in kind) or ("v5litepod" in kind)
    # Only shard the reduction across cores on chips with 2 TensorCores per device
    # (v7x, megacore v4/v5p); on 1-TC v5e/v6e the split is just a serial loop.
    two_tc = any(s in kind for s in ("v7", "v4", "v5p"))
    return (4096 if is_v5e else 8192), (2 if two_tc else 1)


def _mse_kernel(squared_branch, need_mask, scale, tile_rows, tiles_per_core,
                total_rows, first_masked_tile,
                o_ref, t_ref, out_ref, acc_ref):
    c = pl.program_id(0)          # parallel axis: one partial sum per core
    i = pl.program_id(1)          # reduction axis (sequential per core)
    n_i = pl.num_programs(1)

    @pl.when(i == 0)
    def _():
        acc_ref[...] = jnp.zeros_like(acc_ref)

    o = o_ref[...].astype(jnp.float32)
    t = t_ref[...].astype(jnp.float32)

    if squared_branch:            # alpha != -1: accumulate raw (o - t)^2; scale at finalize
        d = o - t
        val = d * d
    else:                         # alpha == -1: accumulate (t - o)
        val = t - o

    def accumulate(v):
        # Reduce the (tile_rows, 128) tile to a single (8, 128) vreg partial.  The
        # reshape only splits the sublane axis by a multiple of 8 (layout-preserving),
        # so the sum is pure elementwise vreg adds on the VPU and the running
        # accumulator stays one vreg -> no per-step accumulator load/store traffic.
        acc_ref[...] += v.reshape(tile_rows // SUBLANE, SUBLANE, LANE).sum(axis=0)

    if need_mask:
        # Nominal (unclamped) tile index; int32 row ids are fine for any realistic
        # size (overflow only beyond ~2^31 rows = ~2^38 elements).
        tile_idx = c * tiles_per_core + i
        is_edge = tile_idx >= first_masked_tile

        @pl.when(jnp.logical_not(is_edge))
        def _():
            accumulate(val)       # interior tiles: zero mask overhead

        @pl.when(is_edge)
        def _():
            # Ragged last tile and clamped duplicate tiles: zero rows past the end
            # (duplicate tiles are fully zeroed by the same condition).
            row_ids = (lax.broadcasted_iota(jnp.int32, val.shape, 0)
                       + tile_idx * tile_rows)
            accumulate(jnp.where(row_ids < total_rows, val, 0.0))
    else:
        accumulate(val)

    @pl.when(i == n_i - 1)
    def _():
        # One cross-lane reduction per core + the single folded constant.
        out_ref[0, 0] = jnp.sum(acc_ref[...]) * scale


def mse_loss(output, target, alpha):
    """mean(0.5*(output-target)^2 / alpha) if alpha != -1 else mean(target-output)."""
    assert output.shape == target.shape, "output/target must have the same shape"
    # alpha is folded into a compile-time constant -> it must be a static Python scalar.
    assert isinstance(alpha, (int, float)), "alpha must be a static Python scalar"
    n = output.size
    assert n > 0

    flat_o = output.reshape(-1)          # keep native dtype; cast happens in-kernel
    flat_t = target.reshape(-1)

    # Minimal pad to an (8*128)-element multiple so the row count is sublane-aligned.
    # Padding is written as real zeros, which contribute 0 in both branches (the mean
    # divides by the true n), so the pad itself needs no masking.
    pad = (-n) % (SUBLANE * LANE)
    if pad:
        flat_o = jnp.pad(flat_o, (0, pad))
        flat_t = jnp.pad(flat_t, (0, pad))

    rows = flat_o.size // LANE           # multiple of 8
    o2 = flat_o.reshape(rows, LANE)
    t2 = flat_t.reshape(rows, LANE)

    max_rows, ncores = _chip_profile()
    itemsize = jnp.dtype(output.dtype).itemsize
    if itemsize < 4:                      # bf16/fp16: keep ~constant bytes per DMA step
        max_rows *= 2
    tile_rows = min(max_rows, rows)       # full-extent block if the input is small

    total_tiles = -(-rows // tile_rows)
    split = ncores if total_tiles >= ncores else 1
    tiles_per_core = -(-total_tiles // split)
    last_block = total_tiles - 1

    ragged = (rows % tile_rows) != 0
    # Tiles with nominal index >= first_masked_tile over-run the rows: the ragged
    # last tile plus any clamped duplicate tile when split*tiles_per_core exceeds
    # total_tiles (duplicates are fully zeroed by the same in-kernel mask).
    first_masked_tile = (rows // tile_rows) if ragged else total_tiles
    need_mask = ragged or (split * tiles_per_core > total_tiles)

    squared_branch = (alpha != -1)
    scale = float(0.5 / alpha / n) if squared_branch else float(1.0 / n)

    def in_index_map(c, i):
        # Clamp so no DMA window starts past the array; over-run rows are masked.
        return (jnp.minimum(c * tiles_per_core + i, last_block), 0)

    kernel = functools.partial(_mse_kernel, squared_branch, need_mask, scale,
                               tile_rows, tiles_per_core, rows, first_masked_tile)

    in_itemsizes = (jnp.dtype(o2.dtype).itemsize, jnp.dtype(t2.dtype).itemsize)
    block_bytes = tile_rows * LANE * sum(in_itemsizes)   # both inputs, one buffer
    # Double-buffered inputs + headroom for f32 intermediates of one tile; keep well
    # under v7x's 64 MiB physical VMEM.
    vmem_limit = min(2 * block_bytes + 3 * tile_rows * LANE * 4 + (2 << 20), 48 << 20)

    cost = pl.CostEstimate(
        flops=3 * rows * LANE,
        transcendentals=0,
        bytes_accessed=o2.size * in_itemsizes[0] + t2.size * in_itemsizes[1] + split * 4)

    partials = pl.pallas_call(
        kernel,
        out_shape=jax.ShapeDtypeStruct((split, 1), jnp.float32),
        grid=(split, tiles_per_core),
        in_specs=[
            pl.BlockSpec((tile_rows, LANE), in_index_map),
            pl.BlockSpec((tile_rows, LANE), in_index_map),
        ],
        out_specs=pl.BlockSpec((1, 1), lambda c, i: (c, 0),
                               memory_space=pltpu.SMEM),
        scratch_shapes=[pltpu.VMEM((SUBLANE, LANE), jnp.float32)],
        compiler_params=pltpu.CompilerParams(
            dimension_semantics=("parallel", "arbitrary"),
            vmem_limit_bytes=int(vmem_limit)),
        cost_estimate=cost,
    )(o2, t2)

    # Sum the (already scaled) per-core partials.
    return jnp.sum(partials)


def mse_loss_ref(output, target, alpha):
    o = output.astype(jnp.float32)
    t = target.astype(jnp.float32)
    if alpha != -1:
        val = 0.5 * (o - t) ** 2 / alpha
    else:
        val = t - o
    return jnp.mean(val)


def _check(name, output, target, alpha, rtol=1e-5, atol=1e-6):
    got = mse_loss(output, target, alpha)
    jax.block_until_ready(got)
    want = mse_loss_ref(output, target, alpha)
    assert jnp.allclose(got, want, rtol=rtol, atol=atol), (name, got, want)


if __name__ == "__main__":
    key = jax.random.PRNGKey(0)
    k1, k2, k3, k4, k5, k6, k7, k8 = jax.random.split(key, 8)

    # Small NCHW prediction/target pair (single-tile path), both alpha branches.
    out_s = jax.random.normal(k1, (2, 4, 16, 16), dtype=jnp.float32)
    tgt_s = jax.random.normal(k2, (2, 4, 16, 16), dtype=jnp.float32)
    _check("small alpha=2", out_s, tgt_s, 2.0)
    _check("small alpha=-1", out_s, tgt_s, -1)

    # Element count not a multiple of 128 (minimal zero-pad path).
    out_r = jax.random.normal(k3, (2, 3, 5, 7), dtype=jnp.float32)
    tgt_r = jax.random.normal(k4, (2, 3, 5, 7), dtype=jnp.float32)
    _check("ragged alpha=0.5", out_r, tgt_r, 0.5)

    # bf16 inputs stay bf16 in HBM; cast to f32 happens in-kernel.
    out_b = jax.random.normal(k5, (2, 8, 32, 32), dtype=jnp.bfloat16)
    tgt_b = jax.random.normal(k6, (2, 8, 32, 32), dtype=jnp.bfloat16)
    _check("bf16 alpha=1.5", out_b, tgt_b, 1.5, atol=1e-5)

    # Multi-tile: exercises the large-tile streaming path, the gated ragged-tile
    # mask and (on 2-TensorCore chips) the per-core split.
    out_l = jax.random.normal(k7, (8, 9, 128, 128), dtype=jnp.float32)
    tgt_l = jax.random.normal(k8, (8, 9, 128, 128), dtype=jnp.float32)
    _check("large alpha=0.7", out_l, tgt_l, 0.7, rtol=1e-4, atol=1e-5)

    print("KERNEL_OK")
</pallas_src>

<mosaic_0001>
module attributes {stable_mosaic.version = 11 : i64} {
  func.func @_mse_kernel(%arg0: i32, %arg1: i32, %arg2: memref<16x128xf32, #tpu.memory_space<vmem>>, %arg3: memref<16x128xf32, #tpu.memory_space<vmem>>, %arg4: memref<1x1xf32, #tpu.memory_space<smem>>, %arg5: memref<8x128xf32, #tpu.memory_space<vmem>>) attributes {dimension_semantics = [#tpu.dimension_semantics<parallel>, #tpu.dimension_semantics<arbitrary>], iteration_bounds = array<i64: 1, 1>, scalar_prefetch = 0 : i64, scratch_operands = 1 : i64, tpu.core_type = #tpu.core_type<tc>, window_params = [{transform_indices = @transform_0, window_bounds = array<i64: 16, 128>}, {transform_indices = @transform_1, window_bounds = array<i64: 16, 128>}, {transform_indices = @transform_2, window_bounds = array<i64: 1, 1>}]} {
    %c0_i32 = arith.constant 0 : i32
    %0 = arith.cmpi eq, %arg1, %c0_i32 : i32
    %1 = arith.extui %0 : i1 to i32
    %c0_i32_0 = arith.constant 0 : i32
    %2 = arith.cmpi ne, %1, %c0_i32_0 : i32
    scf.if %2 {
      %cst_10 = arith.constant 0.000000e+00 : f32
      %15 = vector.broadcast %cst_10 : f32 to vector<8x128xf32>
      %c0_11 = arith.constant 0 : index
      %c0_12 = arith.constant 0 : index
      %16 = vector.load %arg5[%c0_11, %c0_12] : memref<8x128xf32, #tpu.memory_space<vmem>>, vector<8x128xf32>
      tpu.vector_store %arg5[%c0_11, %c0_12], %15 {strides = array<i32>} : memref<8x128xf32, #tpu.memory_space<vmem>>, vector<8x128xf32>,
    } else {
    }
    %c0 = arith.constant 0 : index
    %c0_1 = arith.constant 0 : index
    %3 = vector.load %arg2[%c0, %c0_1] : memref<16x128xf32, #tpu.memory_space<vmem>>, vector<16x128xf32>
    %c0_2 = arith.constant 0 : index
    %c0_3 = arith.constant 0 : index
    %4 = vector.load %arg3[%c0_2, %c0_3] : memref<16x128xf32, #tpu.memory_space<vmem>>, vector<16x128xf32>
    %5 = arith.subf %3, %4 : vector<16x128xf32>
    %6 = arith.mulf %5, %5 : vector<16x128xf32>
    %c0_4 = arith.constant 0 : index
    %c0_5 = arith.constant 0 : index
    %7 = vector.load %arg5[%c0_4, %c0_5] : memref<8x128xf32, #tpu.memory_space<vmem>>, vector<8x128xf32>
    %8 = vector.shape_cast %6 : vector<16x128xf32> to vector<2x8x128xf32>
    %cst = arith.constant dense<0.000000e+00> : vector<8x128xf32>
    %9 = vector.multi_reduction <add>, %8, %cst [0] : vector<2x8x128xf32> to vector<8x128xf32>
    %10 = arith.addf %7, %9 : vector<8x128xf32>
    %c0_6 = arith.constant 0 : index
    %c0_7 = arith.constant 0 : index
    %11 = vector.load %arg5[%c0_6, %c0_7] : memref<8x128xf32, #tpu.memory_space<vmem>>, vector<8x128xf32>
    tpu.vector_store %arg5[%c0_6, %c0_7], %10 {strides = array<i32>} : memref<8x128xf32, #tpu.memory_space<vmem>>, vector<8x128xf32>,
    %c0_i32_8 = arith.constant 0 : i32
    %12 = arith.cmpi eq, %arg1, %c0_i32_8 : i32
    %13 = arith.extui %12 : i1 to i32
    %c0_i32_9 = arith.constant 0 : i32
    %14 = arith.cmpi ne, %13, %c0_i32_9 : i32
    scf.if %14 {
      %c0_10 = arith.constant 0 : index
      %c0_11 = arith.constant 0 : index
      %15 = vector.load %arg5[%c0_10, %c0_11] : memref<8x128xf32, #tpu.memory_space<vmem>>, vector<8x128xf32>
      %16 = vector.shape_cast %15 : vector<8x128xf32> to vector<1x8x128xf32>
      %cst_12 = arith.constant dense<0.000000e+00> : vector<1xf32>
      %17 = vector.multi_reduction <add>, %16, %cst_12 [1, 2] : vector<1x8x128xf32> to vector<1xf32>
      %18 = vector.shape_cast %17 : vector<1xf32> to vector<1x1x1xf32>
      %19 = vector.extract %18[0, 0, 0] : f32 from vector<1x1x1xf32>
      %cst_13 = arith.constant 1.22070313E-4 : f32
      %20 = arith.mulf %19, %cst_13 : f32
      %c0_14 = arith.constant 0 : index
      %c0_15 = arith.constant 0 : index
      %21 = memref.load %arg4[%c0_14, %c0_15] : memref<1x1xf32, #tpu.memory_space<smem>>
      memref.store %20, %arg4[%c0_14, %c0_15] : memref<1x1xf32, #tpu.memory_space<smem>>
    } else {
    }
    return
  }
  func.func @transform_0(%arg0: i32, %arg1: i32) -> (i32, i32) {
    %c1_i32 = arith.constant 1 : i32
    %0 = arith.muli %arg0, %c1_i32 : i32
    %1 = arith.addi %0, %arg1 : i32
    %c0_i32 = arith.constant 0 : i32
    %2 = arith.minsi %1, %c0_i32 : i32
    %c0_i32_0 = arith.constant 0 : i32
    %c0_i32_1 = arith.constant 0 : i32
    return %2, %c0_i32_0 : i32, i32
  }
  func.func @transform_1(%arg0: i32, %arg1: i32) -> (i32, i32) {
    %c1_i32 = arith.constant 1 : i32
    %0 = arith.muli %arg0, %c1_i32 : i32
    %1 = arith.addi %0, %arg1 : i32
    %c0_i32 = arith.constant 0 : i32
    %2 = arith.minsi %1, %c0_i32 : i32
    %c0_i32_0 = arith.constant 0 : i32
    %c0_i32_1 = arith.constant 0 : i32
    return %2, %c0_i32_0 : i32, i32
  }
  func.func @transform_2(%arg0: i32, %arg1: i32) -> (i32, i32) {
    %c0_i32 = arith.constant 0 : i32
    %c0_i32_0 = arith.constant 0 : i32
    return %arg0, %c0_i32 : i32, i32
  }
}

</mosaic_0001>

<bundles_post_ra>
// kernel: tpu_custom_call.1
= control target key start
LH: loop header
LB: loop body
LE: loop exit
PB: predicated region body
PF: predicated region fallthrough
CT: control target
= control target key end

     0   :  { %7 = vsyncpa [#allocation4], 0  ;;  %s202_s0 = inlined_call_operand.hbm [shape: f32[16,128], index: 0, kind: input, shape index: {}]   ;;  %s203_s1 = inlined_call_operand.hbm [shape: f32[16,128], index: 1, kind: input, shape index: {}]   ;;  %s204_s2 = inlined_call_operand.hbm [shape: f32[1,1], index: 2, kind: output, shape index: {}]  }
   0x1   :  { %8 = vsyncpa [#allocation7], 0 }
   0x2   :  { %9 = vsyncpa [#allocation5], 0  ;;  %s173_s9 = smov [#allocation3]  }
   0x3   :  { %s21_s10 = sshll.u32 %s173_s9, 4  ;;  %s22_s10 = int_to_ptr.vmem [resolvable:$true] %s21_s10 }
   0x4   :  { %s127_s11 = scalar_lea.vmem %s22_s10, 256  ;;  %p132_p1 = scmp.lt.s32.totalorder %s22_s10, %s22_s10 }
   0x5   :  { %p128_p0 = scmp.ne.s32.totalorder %s22_s10, %s127_s11  ;;  %p133_p2 = scmp.lt.s32.totalorder %s127_s11, %s127_s11 }
   0x7   :  { %p134_p3 = por %p133_p2, %p132_p1 }
   0x9   :  { %p135_p4 = pnand %p134_p3, %p128_p0 }
   0xb   :  { %138 = shalt.err (!%p135_p4)
}
   0xc   :  { %s174_s12 = smov 128   ;;  %s175_s13 = smov 8  }
   0xd   :  { %27 = dma.hbm_to_vmem [thread:$0]  %s202_s0, 256, %s22_s10, [#allocation4], %s174_s12, %s174_s12, %s175_s13  }
   0xe   :  { %s176_s16 = smov [#allocation6]  }
   0xf   :  { %s39_s17 = sshll.u32 %s176_s16, 4  ;;  %s40_s17 = int_to_ptr.vmem [resolvable:$true] %s39_s17 }
  0x10   :  { %s147_s18 = scalar_lea.vmem %s40_s17, 256  ;;  %p152_p6 = scmp.lt.s32.totalorder %s40_s17, %s40_s17 }
  0x11   :  { %p148_p5 = scmp.ne.s32.totalorder %s40_s17, %s147_s18  ;;  %p153_p7 = scmp.lt.s32.totalorder %s147_s18, %s147_s18 }
  0x13   :  { %p154_p8 = por %p153_p7, %p152_p6 }
  0x15   :  { %p155_p9 = pnand %p154_p8, %p148_p5 }
  0x17   :  { %158 = shalt.err (!%p155_p9)
}
  0x18   :  { %45 = dma.hbm_to_vmem [thread:$0]  %s203_s1, 256, %s40_s17, [#allocation7], %s174_s12, %s174_s12, %s175_s13  }
  0x19   :  { %167 = dma.done.wait [#allocation4], 256  }
  0x1a   :  { %168 = vsyncadd [#allocation4], 4294967040 }
  0x1b   :  { %169 = dma.done.wait [#allocation7], 256  }
  0x1c   :  { %170 = vsyncadd [#allocation7], 4294967040  ;;  %v65_v0 = vld [vmem:[#allocation3] sm:$0xff]  ;;  %v66_v1 = vld [vmem:[#allocation3 + $0x8] sm:$0xff]  ;;  %s177_s21 = smov [#allocation8]  }
  0x1d   :  { %v67_v2 = vld [vmem:[#allocation6] sm:$0xff]  ;;  %v68_v3 = vld [vmem:[#allocation6 + $0x8] sm:$0xff] }
  0x1e   :  { %v69_v4 = vsub.f32 %v65_v0, %v67_v2  ;;  %v70_v5 = vsub.f32 %v66_v1, %v68_v3 }
  0x20   :  { %v71_v6 = vmul.f32 %v69_v4, %v69_v4  ;;  %v72_v7 = vmul.f32 %v70_v5, %v70_v5 }
  0x22   :  { %v74_v8 = vadd.f32 %v72_v7, %v71_v6 }
  0x24   :  { %81 = vadd.xlane.f32.xlu0 %v74_v8 }
  0xad   :  { %v82_v9 = vpop.xlane.xlu0 %81 }
  0xae   :  { %v83_v10 = vrot.slane %v82_v9, 4 }
  0xb0   :  { %v84_v11 = vadd.f32 %v83_v10, %v82_v9 }
  0xb2   :  { %v85_v12 = vrot.slane %v84_v11, 2 }
  0xb4   :  { %v86_v13 = vadd.f32 %v85_v12, %v84_v11 }
  0xb6   :  { %v87_v14 = vrot.slane %v86_v13, 1 }
  0xb8   :  { %v88_v15 = vadd.f32 %v87_v14, %v86_v13 }
  0xba   :  { %112 = vpush %v88_v15 }
  0xeb   :  { %s113_s0 = spop %112 }
  0xec   :  { %s90_s1 = smul.f32 0.00012207031, %s113_s0 }
  0xee   :  { %92 = sst [smem:[#allocation8]] %s90_s1 }
  0xef   :  { %100 = dma.smem_to_hbm %s177_s21, 16, %s204_s2, [#allocation5]  }
  0xf0   :  { %171 = dma.done.wait [#allocation5], 16  }
  0xf1   :  { %172 = vsyncadd [#allocation5], 4294967280 }
  0xf2   :  { %104 = sfence }
  0xf3   :  { %105 = vsyncpa [#allocation4], 1 }
  0xf4   :  { %106 = vsyncpa [#allocation7], 1 }
  0xf5   :  { %107 = vsyncpa [#allocation5], 1 }

</bundles_post_ra>
